<compile_context>
chip_gen: v7x
topology: tpu7x:2x2x1
jax: 0.10.0
libtpu: 0.0.40
codegen_flags: <defaults>
</compile_context>

<pallas_src>
import functools

import jax
import jax.numpy as jnp
import numpy as np
from jax.experimental import pallas as pl
from jax.experimental.pallas import tpu as pltpu

EPS = 1e-5

# MXU operand dtype for the two conv dots.  float32 preserves PyTorch fp32
# semantics; set to jnp.bfloat16 on v6e/v7x for ~2x MXU throughput.
MATMUL_DTYPE = jnp.float32


def _double_conv_kernel(rows1_ref, wb1_ref, wb2_ref, g1_ref, be1_ref,
                        g2_ref, be2_ref, grp_ref, grpT_ref, out_ref,
                        *, N, H, W):
    """Fused DoubleConv, all operands resident in VMEM (gridless call).

    rows1_ref : (N*H, 3*W*Cin)     H-halo im2col'd, channel-packed input rows
    wb1_ref   : (3*W*Cin,  W*Cout) banded conv1 weights (kh/kw taps + W-pad folded)
    wb2_ref   : (3*W*Cout, W*Cout) banded conv2 weights
    g*/be*    : (1, Cout)          BatchNorm gamma / beta
    grp_ref   : (W*Cout, Cout)     lane -> channel grouping matrix
    grpT_ref  : (Cout, W*Cout)     channel -> lane broadcast matrix
    out_ref   : (N*H, W*Cout)      lane-dense output slab
    """
    M = N * H
    WCout = out_ref.shape[-1]
    inv_count = 1.0 / float(N * H * W)

    def bn_relu(acc, gamma, beta):
        # One stats traversal; stacked (2, .) operands halve the tiny M=1 dots.
        col_sum = jnp.sum(acc, axis=0, keepdims=True)                 # (1, W*C)
        col_sq = jnp.sum(acc * acc, axis=0, keepdims=True)            # (1, W*C)
        stats = jnp.concatenate([col_sum, col_sq], axis=0)            # (2, W*C)
        chan = jnp.dot(stats, grp_ref[...],
                       preferred_element_type=jnp.float32)            # (2, C)
        mean = chan[0:1] * inv_count
        var = chan[1:2] * inv_count - mean * mean                     # biased batch var
        # TODO(synk): use a two-pass / mean-subtracted variance in the scaled
        # cross-tile BN reduction (E[x^2]-mean^2 can cancel catastrophically).
        scale_c = gamma * jax.lax.rsqrt(var + EPS)                    # (1, C)
        shift_c = beta - mean * scale_c                               # (1, C)
        ss = jnp.dot(jnp.concatenate([scale_c, shift_c], axis=0),
                     grpT_ref[...],
                     preferred_element_type=jnp.float32)              # (2, W*C)
        return jnp.maximum(acc * ss[0:1] + ss[1:2], 0.0)

    # ---- conv1: one MXU dot, K = 3*W*Cin (halo im2col done wrapper-side) ----
    acc1 = jnp.dot(rows1_ref[...], wb1_ref[...],
                   preferred_element_type=jnp.float32)                # (M, W*Cout) f32
    y1 = bn_relu(acc1, g1_ref[...], be1_ref[...])

    # ---- conv2: 3-tap H-halo slab built from the live y1 value --------------
    # up[m] = y1[m-1] (zero at h==0), dn[m] = y1[m+1] (zero at h==H-1); the
    # same masks also kill the batch-boundary bleed of the global shift.
    h_idx = jax.lax.broadcasted_iota(jnp.int32, (M, 1), 0) % H
    zero_row = jnp.zeros((1, WCout), jnp.float32)
    up = jnp.where(h_idx == 0, 0.0,
                   jnp.concatenate([zero_row, y1[:M - 1, :]], axis=0))
    dn = jnp.where(h_idx == H - 1, 0.0,
                   jnp.concatenate([y1[1:, :], zero_row], axis=0))
    rows2 = jnp.concatenate([up, y1, dn], axis=-1)                    # (M, 3*W*Cout)

    acc2 = jnp.dot(rows2.astype(MATMUL_DTYPE), wb2_ref[...],
                   preferred_element_type=jnp.float32)
    y2 = bn_relu(acc2, g2_ref[...], be2_ref[...])

    # TODO(synk): at real tile sizes, accumulate conv results into an explicit
    # f32 VMEM scratch (matmul P3 pattern) once M_tile*W*Cout*4B > ~256 KiB.

    # Lane-dense (N*H, W*Cout) store: full-width unmasked vst.
    out_ref[...] = y2.astype(out_ref.dtype)


def _make_banded_weights(w, W):
    """w: (3, 3, Ci, Co) HWIO -> (3*W*Ci, W*Co) flattened banded matrix.

    B[kh*W*Ci + wi*Ci + ci, wo*Co + co] = w[kh, wi - wo + 1, ci, co] when the
    kw tap is in range, else 0 — i.e. the kw taps and the width-direction
    "same" zero-padding are folded into the weight matrix.
    """
    _, _, Ci, Co = w.shape
    wi = jnp.arange(W)[:, None]
    wo = jnp.arange(W)[None, :]
    kw = wi - wo + 1                                    # tap index for (wi, wo)
    valid = (kw >= 0) & (kw <= 2)
    g = w[:, jnp.clip(kw, 0, 2)]                        # (3, W, W, Ci, Co)
    g = jnp.where(valid[None, :, :, None, None], g, 0.0)
    g = jnp.transpose(g, (0, 1, 3, 2, 4))               # (3, W, Ci, W, Co)
    return g.reshape(3 * W * Ci, W * Co)


def double_conv(x_nchw, w1, g1, b1, w2, g2, b2):
    """x_nchw: (N, Cin, H, W) f32 -> (N, Cout, H, W) f32 (training-mode BN)."""
    N, Cin, H, W = x_nchw.shape
    Cout = w1.shape[-1]
    WCin, WCout = W * Cin, W * Cout

    # Layout plumbing (fused by XLA into the input DMA): NCHW -> channel-packed
    # rows, H "same"-padding, and the 3-tap H-halo im2col, so the kernel sees a
    # single lane-dense (N*H, 3*W*Cin) slab and needs no staging scratch.
    x_rows = jnp.transpose(x_nchw, (0, 2, 3, 1)).reshape(N, H, WCin)
    xp = jnp.pad(x_rows, ((0, 0), (1, 1), (0, 0)))
    rows1 = jnp.concatenate(
        [xp[:, 0:H], xp[:, 1:H + 1], xp[:, 2:H + 2]], axis=-1
    ).reshape(N * H, 3 * WCin).astype(MATMUL_DTYPE)

    wb1 = _make_banded_weights(w1, W).astype(MATMUL_DTYPE)          # (3*W*Cin,  W*Cout)
    wb2 = _make_banded_weights(w2, W).astype(MATMUL_DTYPE)          # (3*W*Cout, W*Cout)
    # TODO(synk): bound the W-banded folding to W_tile*Cout ~ 128-512 lanes; at
    # deeper UNet stages (C >= 64) switch to a channels-in-K / im2col layout.
    grp = jnp.tile(jnp.eye(Cout, dtype=jnp.float32), (W, 1))        # (W*Cout, Cout)
    grpT = jnp.transpose(grp)                                       # (Cout, W*Cout)

    vmem = pl.BlockSpec(memory_space=pltpu.MemorySpace.VMEM)
    kernel = functools.partial(_double_conv_kernel, N=N, H=H, W=W)
    out2d = pl.pallas_call(
        kernel,
        out_shape=jax.ShapeDtypeStruct((N * H, WCout), jnp.float32),
        in_specs=[vmem] * 9,
        out_specs=vmem,
        # TODO(synk): at real UNet sizes, add a halo-tiled grid over N*H rows
        # (BlockSpec pipelining, ~512-1024-row tiles), a two-pass cross-tile
        # BatchNorm reduction, dimension_semantics=("parallel",) so v7x's two
        # TensorCores both run, and vmem_limit_bytes sized for v7x's 64 MiB/TC.
    )(rows1, wb1, wb2,
      g1.reshape(1, Cout), b1.reshape(1, Cout),
      g2.reshape(1, Cout), b2.reshape(1, Cout),
      grp, grpT)

    # Unpack the lane-dense slab back to NCHW (wrapper-side layout plumbing).
    return out2d.reshape(N, H, W, Cout).transpose(0, 3, 1, 2)


def reference_double_conv(x_nchw, w1, g1, b1, w2, g2, b2):
    """Pure-JAX reference (lax conv + training-mode BatchNorm) for checking."""
    x = jnp.transpose(x_nchw, (0, 2, 3, 1))

    def conv(x, w):
        return jax.lax.conv_general_dilated(
            x, w, window_strides=(1, 1), padding="SAME",
            dimension_numbers=("NHWC", "HWIO", "NHWC"))

    def bn_relu(y, g, b):
        m = jnp.mean(y, axis=(0, 1, 2), keepdims=True)
        v = jnp.mean((y - m) ** 2, axis=(0, 1, 2), keepdims=True)
        return jnp.maximum((y - m) * jax.lax.rsqrt(v + EPS)
                           * g.reshape(1, 1, 1, -1) + b.reshape(1, 1, 1, -1), 0.0)

    y = bn_relu(conv(x, w1), g1, b1)
    y = bn_relu(conv(y, w2), g2, b2)
    return jnp.transpose(y, (0, 3, 1, 2))


if __name__ == "__main__":
    # DoubleConv(in_channels=4, out_channels=8) at small shapes.
    N, Cin, Cout, H, W = 2, 4, 8, 16, 16

    key = jax.random.PRNGKey(0)
    kx, kw1, kw2 = jax.random.split(key, 3)

    x = jax.random.normal(kx, (N, Cin, H, W), jnp.float32)

    # Conv weights (HWIO), kaiming-like scale; bias=False per the module.
    w1 = jax.random.normal(kw1, (3, 3, Cin, Cout), jnp.float32) * (1.0 / np.sqrt(9 * Cin))
    w2 = jax.random.normal(kw2, (3, 3, Cout, Cout), jnp.float32) * (1.0 / np.sqrt(9 * Cout))

    # BatchNorm affine params at PyTorch init: gamma=1, beta=0.
    g1 = jnp.ones((Cout,), jnp.float32)
    b1 = jnp.zeros((Cout,), jnp.float32)
    g2 = jnp.ones((Cout,), jnp.float32)
    b2 = jnp.zeros((Cout,), jnp.float32)

    out = jax.block_until_ready(jax.jit(double_conv)(x, w1, g1, b1, w2, g2, b2))
    ref = jax.block_until_ready(reference_double_conv(x, w1, g1, b1, w2, g2, b2))

    np.testing.assert_allclose(np.asarray(out), np.asarray(ref), rtol=1e-3, atol=1e-3)
    print("KERNEL_OK")
</pallas_src>

<mosaic_0001>
module attributes {stable_mosaic.version = 11 : i64} {
  func.func @_double_conv_kernel(%arg0: memref<32x192xf32, #tpu.memory_space<vmem>>, %arg1: memref<192x128xf32, #tpu.memory_space<vmem>>, %arg2: memref<384x128xf32, #tpu.memory_space<vmem>>, %arg3: memref<1x8xf32, #tpu.memory_space<vmem>>, %arg4: memref<1x8xf32, #tpu.memory_space<vmem>>, %arg5: memref<1x8xf32, #tpu.memory_space<vmem>>, %arg6: memref<1x8xf32, #tpu.memory_space<vmem>>, %arg7: memref<128x8xf32, #tpu.memory_space<vmem>>, %arg8: memref<8x128xf32, #tpu.memory_space<vmem>>, %arg9: memref<32x128xf32, #tpu.memory_space<vmem>>) attributes {dimension_semantics = [], scalar_prefetch = 0 : i64, scratch_operands = 0 : i64, tpu.core_type = #tpu.core_type<tc>} {
    %c0 = arith.constant 0 : index
    %c0_0 = arith.constant 0 : index
    %0 = vector.load %arg0[%c0, %c0_0] : memref<32x192xf32, #tpu.memory_space<vmem>>, vector<32x192xf32>
    %c0_1 = arith.constant 0 : index
    %c0_2 = arith.constant 0 : index
    %1 = vector.load %arg1[%c0_1, %c0_2] : memref<192x128xf32, #tpu.memory_space<vmem>>, vector<192x128xf32>
    %cst = arith.constant dense<0.000000e+00> : vector<32x128xf32>
    %2 = tpu.matmul %0, %1, %cst {dimension_numbers = #tpu.dot_dimension_numbers<[1], [0], [0], [1], [0, 0, 1, 1], [], []>} : vector<32x192xf32>, vector<192x128xf32>, vector<32x128xf32> -> vector<32x128xf32>
    %c0_3 = arith.constant 0 : index
    %c0_4 = arith.constant 0 : index
    %3 = vector.load %arg3[%c0_3, %c0_4] : memref<1x8xf32, #tpu.memory_space<vmem>>, vector<1x8xf32>
    %c0_5 = arith.constant 0 : index
    %c0_6 = arith.constant 0 : index
    %4 = vector.load %arg4[%c0_5, %c0_6] : memref<1x8xf32, #tpu.memory_space<vmem>>, vector<1x8xf32>
    %cst_7 = arith.constant dense<0.000000e+00> : vector<128xf32>
    %5 = vector.multi_reduction <add>, %2, %cst_7 [0] : vector<32x128xf32> to vector<128xf32>
    %6 = vector.shape_cast %5 : vector<128xf32> to vector<1x128xf32>
    %7 = arith.mulf %2, %2 : vector<32x128xf32>
    %cst_8 = arith.constant dense<0.000000e+00> : vector<128xf32>
    %8 = vector.multi_reduction <add>, %7, %cst_8 [0] : vector<32x128xf32> to vector<128xf32>
    %9 = vector.shape_cast %8 : vector<128xf32> to vector<1x128xf32>
    %10 = tpu.concatenate %6, %9 in 0 : vector<1x128xf32>, vector<1x128xf32> -> vector<2x128xf32>
    %c0_9 = arith.constant 0 : index
    %c0_10 = arith.constant 0 : index
    %11 = vector.load %arg7[%c0_9, %c0_10] : memref<128x8xf32, #tpu.memory_space<vmem>>, vector<128x8xf32>
    %cst_11 = arith.constant dense<0.000000e+00> : vector<2x8xf32>
    %12 = tpu.matmul %10, %11, %cst_11 {dimension_numbers = #tpu.dot_dimension_numbers<[1], [0], [0], [1], [0, 0, 1, 1], [], []>} : vector<2x128xf32>, vector<128x8xf32>, vector<2x8xf32> -> vector<2x8xf32>
    %13 = vector.extract_strided_slice %12 {offsets = [0, 0], sizes = [1, 8], strides = [1, 1]} : vector<2x8xf32> to vector<1x8xf32>
    %cst_12 = arith.constant 0.001953125 : f32
    %14 = vector.broadcast %cst_12 : f32 to vector<1x8xf32>
    %15 = arith.mulf %13, %14 : vector<1x8xf32>
    %16 = vector.extract_strided_slice %12 {offsets = [1, 0], sizes = [1, 8], strides = [1, 1]} : vector<2x8xf32> to vector<1x8xf32>
    %cst_13 = arith.constant 0.001953125 : f32
    %17 = vector.broadcast %cst_13 : f32 to vector<1x8xf32>
    %18 = arith.mulf %16, %17 : vector<1x8xf32>
    %19 = arith.mulf %15, %15 : vector<1x8xf32>
    %20 = arith.subf %18, %19 : vector<1x8xf32>
    %cst_14 = arith.constant 9.99999974E-6 : f32
    %21 = vector.broadcast %cst_14 : f32 to vector<1x8xf32>
    %22 = arith.addf %20, %21 : vector<1x8xf32>
    %23 = math.rsqrt %22 : vector<1x8xf32>
    %24 = arith.mulf %3, %23 : vector<1x8xf32>
    %25 = arith.mulf %15, %24 : vector<1x8xf32>
    %26 = arith.subf %4, %25 : vector<1x8xf32>
    %27 = tpu.concatenate %24, %26 in 0 : vector<1x8xf32>, vector<1x8xf32> -> vector<2x8xf32>
    %c0_15 = arith.constant 0 : index
    %c0_16 = arith.constant 0 : index
    %28 = vector.load %arg8[%c0_15, %c0_16] : memref<8x128xf32, #tpu.memory_space<vmem>>, vector<8x128xf32>
    %cst_17 = arith.constant dense<0.000000e+00> : vector<2x128xf32>
    %29 = tpu.matmul %27, %28, %cst_17 {dimension_numbers = #tpu.dot_dimension_numbers<[1], [0], [0], [1], [0, 0, 1, 1], [], []>} : vector<2x8xf32>, vector<8x128xf32>, vector<2x128xf32> -> vector<2x128xf32>
    %30 = vector.extract_strided_slice %29 {offsets = [0, 0], sizes = [1, 128], strides = [1, 1]} : vector<2x128xf32> to vector<1x128xf32>
    %31 = vector.broadcast %30 : vector<1x128xf32> to vector<32x128xf32>
    %32 = arith.mulf %2, %31 : vector<32x128xf32>
    %33 = vector.extract_strided_slice %29 {offsets = [1, 0], sizes = [1, 128], strides = [1, 1]} : vector<2x128xf32> to vector<1x128xf32>
    %34 = vector.broadcast %33 : vector<1x128xf32> to vector<32x128xf32>
    %35 = arith.addf %32, %34 : vector<32x128xf32>
    %cst_18 = arith.constant 0.000000e+00 : f32
    %36 = vector.broadcast %cst_18 : f32 to vector<32x128xf32>
    %37 = arith.maximumf %35, %36 : vector<32x128xf32>
    %38 = tpu.iota {dimensions = array<i32: 0>} : vector<32x1xi32>
    %c16_i32 = arith.constant 16 : i32
    %c0_i32 = arith.constant 0 : i32
    %39 = arith.cmpi eq, %c16_i32, %c0_i32 : i32
    %c1_i32 = arith.constant 1 : i32
    %40 = arith.select %39, %c1_i32, %c16_i32 : i32
    %41 = vector.broadcast %40 : i32 to vector<32x1xi32>
    %42 = arith.remsi %38, %41 : vector<32x1xi32>
    %c0_i32_19 = arith.constant 0 : i32
    %43 = vector.broadcast %c0_i32_19 : i32 to vector<32x1xi32>
    %44 = arith.cmpi ne, %42, %43 : vector<32x1xi32>
    %c0_i32_20 = arith.constant 0 : i32
    %45 = vector.broadcast %c0_i32_20 : i32 to vector<32x1xi32>
    %46 = arith.cmpi slt, %42, %45 : vector<32x1xi32>
    %c0_i32_21 = arith.constant 0 : i32
    %47 = arith.cmpi slt, %40, %c0_i32_21 : i32
    %48 = vector.broadcast %47 : i1 to vector<32x1xi1>
    %49 = vector.broadcast %48 : vector<32x1xi1> to vector<32x1xi1>
    %50 = arith.xori %46, %49 : vector<32x1xi1>
    %51 = arith.andi %50, %44 : vector<32x1xi1>
    %52 = vector.broadcast %40 : i32 to vector<32x1xi32>
    %53 = arith.addi %42, %52 : vector<32x1xi32>
    %54 = arith.select %51, %53, %42 : vector<32x1xi1>, vector<32x1xi32>
    %cst_22 = arith.constant 0.000000e+00 : f32
    %55 = vector.broadcast %cst_22 : f32 to vector<1x128xf32>
    %c0_i32_23 = arith.constant 0 : i32
    %56 = vector.broadcast %c0_i32_23 : i32 to vector<32x1xi32>
    %57 = arith.cmpi eq, %54, %56 : vector<32x1xi32>
    %58 = vector.extract_strided_slice %37 {offsets = [0, 0], sizes = [31, 128], strides = [1, 1]} : vector<32x128xf32> to vector<31x128xf32>
    %59 = tpu.concatenate %55, %58 in 0 : vector<1x128xf32>, vector<31x128xf32> -> vector<32x128xf32>
    %cst_24 = arith.constant 0.000000e+00 : f32
    %60 = vector.shape_cast %57 : vector<32x1xi1> to vector<32x1xi1>
    %61 = vector.broadcast %60 : vector<32x1xi1> to vector<32x128xi1>
    %62 = vector.broadcast %cst_24 : f32 to vector<32x128xf32>
    %63 = arith.select %61, %62, %59 : vector<32x128xi1>, vector<32x128xf32>
    %c15_i32 = arith.constant 15 : i32
    %64 = vector.broadcast %c15_i32 : i32 to vector<32x1xi32>
    %65 = arith.cmpi eq, %54, %64 : vector<32x1xi32>
    %66 = vector.extract_strided_slice %37 {offsets = [1, 0], sizes = [31, 128], strides = [1, 1]} : vector<32x128xf32> to vector<31x128xf32>
    %67 = tpu.concatenate %66, %55 in 0 : vector<31x128xf32>, vector<1x128xf32> -> vector<32x128xf32>
    %cst_25 = arith.constant 0.000000e+00 : f32
    %68 = vector.shape_cast %65 : vector<32x1xi1> to vector<32x1xi1>
    %69 = vector.broadcast %68 : vector<32x1xi1> to vector<32x128xi1>
    %70 = vector.broadcast %cst_25 : f32 to vector<32x128xf32>
    %71 = arith.select %69, %70, %67 : vector<32x128xi1>, vector<32x128xf32>
    %72 = tpu.concatenate %63, %37, %71 in 1 : vector<32x128xf32>, vector<32x128xf32>, vector<32x128xf32> -> vector<32x384xf32>
    %c0_26 = arith.constant 0 : index
    %c0_27 = arith.constant 0 : index
    %73 = vector.load %arg2[%c0_26, %c0_27] : memref<384x128xf32, #tpu.memory_space<vmem>>, vector<384x128xf32>
    %cst_28 = arith.constant dense<0.000000e+00> : vector<32x128xf32>
    %74 = tpu.matmul %72, %73, %cst_28 {dimension_numbers = #tpu.dot_dimension_numbers<[1], [0], [0], [1], [0, 0, 1, 1], [], []>} : vector<32x384xf32>, vector<384x128xf32>, vector<32x128xf32> -> vector<32x128xf32>
    %c0_29 = arith.constant 0 : index
    %c0_30 = arith.constant 0 : index
    %75 = vector.load %arg5[%c0_29, %c0_30] : memref<1x8xf32, #tpu.memory_space<vmem>>, vector<1x8xf32>
    %c0_31 = arith.constant 0 : index
    %c0_32 = arith.constant 0 : index
    %76 = vector.load %arg6[%c0_31, %c0_32] : memref<1x8xf32, #tpu.memory_space<vmem>>, vector<1x8xf32>
    %cst_33 = arith.constant dense<0.000000e+00> : vector<128xf32>
    %77 = vector.multi_reduction <add>, %74, %cst_33 [0] : vector<32x128xf32> to vector<128xf32>
    %78 = vector.shape_cast %77 : vector<128xf32> to vector<1x128xf32>
    %79 = arith.mulf %74, %74 : vector<32x128xf32>
    %cst_34 = arith.constant dense<0.000000e+00> : vector<128xf32>
    %80 = vector.multi_reduction <add>, %79, %cst_34 [0] : vector<32x128xf32> to vector<128xf32>
    %81 = vector.shape_cast %80 : vector<128xf32> to vector<1x128xf32>
    %82 = tpu.concatenate %78, %81 in 0 : vector<1x128xf32>, vector<1x128xf32> -> vector<2x128xf32>
    %c0_35 = arith.constant 0 : index
    %c0_36 = arith.constant 0 : index
    %83 = vector.load %arg7[%c0_35, %c0_36] : memref<128x8xf32, #tpu.memory_space<vmem>>, vector<128x8xf32>
    %cst_37 = arith.constant dense<0.000000e+00> : vector<2x8xf32>
    %84 = tpu.matmul %82, %83, %cst_37 {dimension_numbers = #tpu.dot_dimension_numbers<[1], [0], [0], [1], [0, 0, 1, 1], [], []>} : vector<2x128xf32>, vector<128x8xf32>, vector<2x8xf32> -> vector<2x8xf32>
    %85 = vector.extract_strided_slice %84 {offsets = [0, 0], sizes = [1, 8], strides = [1, 1]} : vector<2x8xf32> to vector<1x8xf32>
    %cst_38 = arith.constant 0.001953125 : f32
    %86 = vector.broadcast %cst_38 : f32 to vector<1x8xf32>
    %87 = arith.mulf %85, %86 : vector<1x8xf32>
    %88 = vector.extract_strided_slice %84 {offsets = [1, 0], sizes = [1, 8], strides = [1, 1]} : vector<2x8xf32> to vector<1x8xf32>
    %cst_39 = arith.constant 0.001953125 : f32
    %89 = vector.broadcast %cst_39 : f32 to vector<1x8xf32>
    %90 = arith.mulf %88, %89 : vector<1x8xf32>
    %91 = arith.mulf %87, %87 : vector<1x8xf32>
    %92 = arith.subf %90, %91 : vector<1x8xf32>
    %cst_40 = arith.constant 9.99999974E-6 : f32
    %93 = vector.broadcast %cst_40 : f32 to vector<1x8xf32>
    %94 = arith.addf %92, %93 : vector<1x8xf32>
    %95 = math.rsqrt %94 : vector<1x8xf32>
    %96 = arith.mulf %75, %95 : vector<1x8xf32>
    %97 = arith.mulf %87, %96 : vector<1x8xf32>
    %98 = arith.subf %76, %97 : vector<1x8xf32>
    %99 = tpu.concatenate %96, %98 in 0 : vector<1x8xf32>, vector<1x8xf32> -> vector<2x8xf32>
    %c0_41 = arith.constant 0 : index
    %c0_42 = arith.constant 0 : index
    %100 = vector.load %arg8[%c0_41, %c0_42] : memref<8x128xf32, #tpu.memory_space<vmem>>, vector<8x128xf32>
    %cst_43 = arith.constant dense<0.000000e+00> : vector<2x128xf32>
    %101 = tpu.matmul %99, %100, %cst_43 {dimension_numbers = #tpu.dot_dimension_numbers<[1], [0], [0], [1], [0, 0, 1, 1], [], []>} : vector<2x8xf32>, vector<8x128xf32>, vector<2x128xf32> -> vector<2x128xf32>
    %102 = vector.extract_strided_slice %101 {offsets = [0, 0], sizes = [1, 128], strides = [1, 1]} : vector<2x128xf32> to vector<1x128xf32>
    %103 = vector.broadcast %102 : vector<1x128xf32> to vector<32x128xf32>
    %104 = arith.mulf %74, %103 : vector<32x128xf32>
    %105 = vector.extract_strided_slice %101 {offsets = [1, 0], sizes = [1, 128], strides = [1, 1]} : vector<2x128xf32> to vector<1x128xf32>
    %106 = vector.broadcast %105 : vector<1x128xf32> to vector<32x128xf32>
    %107 = arith.addf %104, %106 : vector<32x128xf32>
    %cst_44 = arith.constant 0.000000e+00 : f32
    %108 = vector.broadcast %cst_44 : f32 to vector<32x128xf32>
    %109 = arith.maximumf %107, %108 : vector<32x128xf32>
    %c0_45 = arith.constant 0 : index
    %c0_46 = arith.constant 0 : index
    %110 = vector.load %arg9[%c0_45, %c0_46] : memref<32x128xf32, #tpu.memory_space<vmem>>, vector<32x128xf32>
    tpu.vector_store %arg9[%c0_45, %c0_46], %109 {strides = array<i32>} : memref<32x128xf32, #tpu.memory_space<vmem>>, vector<32x128xf32>,
    return
  }
}

</mosaic_0001>

<bundles_post_ra>
// kernel: tile.9
= control target key start
LH: loop header
LB: loop body
LE: loop exit
PB: predicated region body
PF: predicated region fallthrough
CT: control target
= control target key end

     0   :  { %vm6_vm0 = vcmask 1043458   ;;  %vm10_vm1 = vcmask 1045508   ;;  %vm14_vm2 = vcmask 1047558   ;;  %s19_s6 = smov 3  ;;  %s22_s7 = smov 12  ;;  %vm16_vm3 = vcmask 64512   ;;  %s736_s0 = inlined_call_operand.vmem [shape: f32[16,8,8], index: 0, kind: input, shape index: {}]   ;;  %s737_s1 = inlined_call_operand.vmem [shape: f32[128,8], index: 1, kind: output, shape index: {}]  }
   0x1   :  { %v348_v0 = vld [vmem:[%s736_s0 + $0xf] ss:$16 sm:%s19_s6]   ;;  %s27_s12 = smov 48  ;;  %s32_s13 = smov 192  ;;  %vm38_vm4 = vcmask 1048512   ;;  %vm60_vm5 = vcmask 982912  }
   0x2   :  { %v349_v1 = vld [vmem:[%s736_s0 + $0xf] ss:$16 sm:%s22_s7]   ;;  %s63_s18 = smov 3  ;;  %s66_s21 = smov 12  ;;  %vm82_vm6 = vcmask 917312   ;;  %vm104_vm7 = vcmask 851712  }
   0x3   :  { %v25_v2 = vsel %vm6_vm0, %v349_v1, %v348_v0  ;;  %v350_v3 = vld [vmem:[%s736_s0 + $0xf] ss:$16 sm:%s27_s12]   ;;  %v356_v6 = vld [vmem:[%s736_s0 + $0xd] ss:$16 sm:%s63_s18]   ;;  %s71_s22 = smov 48  ;;  %s76_s27 = smov 192 }
   0x4   :  { %v351_v4 = vld [vmem:[%s736_s0 + $0xf] ss:$16 sm:%s32_s13]   ;;  %v30_v5 = vsel %vm10_vm1, %v350_v3, %v25_v2  ;;  %v357_v8 = vld [vmem:[%s736_s0 + $0xd] ss:$16 sm:%s66_s21]   ;;  %s423_s28 = smov 120   ;;  %s41_s2 = smov 3 }
   0x5   :  { %v35_v7 = vsel %vm14_vm2, %v351_v4, %v30_v5  ;;  %v358_v9 = vld [vmem:[%s736_s0 + $0xd] ss:$16 sm:%s71_s22]   ;;  %v69_v10 = vsel %vm6_vm0, %v357_v8, %v356_v6  ;;  %s44_s3 = smov 12  ;;  %v352_v13 = vld [vmem:[%s736_s0 + $0xe] ss:$16 sm:%s41_s2]   ;;  %s49_s8 = smov 48 }
   0x6   :  { %36 = vrot.lane.b32.xlu0 %v35_v7, %s423_s28  ;;  %v359_v11 = vld [vmem:[%s736_s0 + $0xd] ss:$16 sm:%s76_s27]   ;;  %v74_v12 = vsel %vm10_vm1, %v358_v9, %v69_v10  ;;  %s54_s9 = smov 192  ;;  %s85_s14 = smov 3  ;;  %vm126_vm8 = vcmask 786112   ;;  %vm148_vm9 = vcmask 720512  }
   0x7   :  { %v353_v14 = vld [vmem:[%s736_s0 + $0xe] ss:$16 sm:%s44_s3]   ;;  %v79_v15 = vsel %vm14_vm2, %v359_v11, %v74_v12  ;;  %s424_s15 = smov 104   ;;  %v360_v20 = vld [vmem:[%s736_s0 + $0xc] ss:$16 sm:%s85_s14]   ;;  %s88_s18 = smov 12 }
   0x8   :  { %v47_v16 = vsel %vm6_vm0, %v353_v14, %v352_v13  ;;  %v354_v17 = vld [vmem:[%s736_s0 + $0xe] ss:$16 sm:%s49_s8]   ;;  %80 = vrot.lane.b32.xlu1 %v79_v15, %s424_s15  ;;  %s93_s19 = smov 48  ;;  %s98_s24 = smov 192  ;;  %vm170_vm10 = vcmask 654912   ;;  %vm192_vm11 = vcmask 589312  }
   0x9   :  { %v355_v18 = vld [vmem:[%s736_s0 + $0xe] ss:$16 sm:%s54_s9]   ;;  %v52_v19 = vsel %vm10_vm1, %v354_v17, %v47_v16  ;;  %v361_v22 = vld [vmem:[%s736_s0 + $0xc] ss:$16 sm:%s88_s18]   ;;  %s425_s25 = smov 112   ;;  %s107_s28 = smov 3 }
   0xa   :  { %v57_v21 = vsel %vm14_vm2, %v355_v18, %v52_v19  ;;  %v362_v23 = vld [vmem:[%s736_s0 + $0xc] ss:$16 sm:%s93_s19]   ;;  %v91_v24 = vsel %vm6_vm0, %v361_v22, %v360_v20  ;;  %s110_s29 = smov 12  ;;  %v364_v27 = vld [vmem:[%s736_s0 + $0xb] ss:$16 sm:%s107_s28]   ;;  %s115_s5 = smov 48 }
   0xb   :  { %58 = vrot.lane.b32.xlu0 %v57_v21, %s425_s25  ;;  %v363_v25 = vld [vmem:[%s736_s0 + $0xc] ss:$16 sm:%s98_s24]   ;;  %v96_v26 = vsel %vm10_vm1, %v362_v23, %v91_v24  ;;  %s120_s6 = smov 192  ;;  %s129_s11 = smov 3  ;;  %vm214_vm12 = vcmask 523712   ;;  %vm236_vm13 = vcmask 458112  }
   0xc   :  { %v365_v28 = vld [vmem:[%s736_s0 + $0xb] ss:$16 sm:%s110_s29]   ;;  %v101_v29 = vsel %vm14_vm2, %v363_v25, %v96_v26  ;;  %s426_s12 = smov 96   ;;  %v368_v34 = vld [vmem:[%s736_s0 + $0xa] ss:$16 sm:%s129_s11]   ;;  %s132_s15 = smov 12 }
   0xd   :  { %v113_v30 = vsel %vm6_vm0, %v365_v28, %v364_v27  ;;  %v366_v31 = vld [vmem:[%s736_s0 + $0xb] ss:$16 sm:%s115_s5]   ;;  %102 = vrot.lane.b32.xlu1 %v101_v29, %s426_s12  ;;  %s137_s16 = smov 48  ;;  %s142_s21 = smov 192  ;;  %vm258_vm14 = vcmask 392512   ;;  %vm280_vm15 = vcmask 326912  }
   0xe   :  { %v367_v32 = vld [vmem:[%s736_s0 + $0xb] ss:$16 sm:%s120_s6]   ;;  %v118_v33 = vsel %vm10_vm1, %v366_v31, %v113_v30  ;;  %v369_v36 = vld [vmem:[%s736_s0 + $0xa] ss:$16 sm:%s132_s15]   ;;  %s427_s22 = smov 88   ;;  %s151_s25 = smov 3 }
   0xf   :  { %v123_v35 = vsel %vm14_vm2, %v367_v32, %v118_v33  ;;  %v370_v37 = vld [vmem:[%s736_s0 + $0xa] ss:$16 sm:%s137_s16]   ;;  %v135_v38 = vsel %vm6_vm0, %v369_v36, %v368_v34  ;;  %s154_s26 = smov 12  ;;  %v372_v41 = vld [vmem:[%s736_s0 + $0x9] ss:$16 sm:%s151_s25]   ;;  %s159_s2 = smov 48 }
  0x10   :  { %124 = vrot.lane.b32.xlu0 %v123_v35, %s427_s22  ;;  %v371_v39 = vld [vmem:[%s736_s0 + $0xa] ss:$16 sm:%s142_s21]   ;;  %v140_v40 = vsel %vm10_vm1, %v370_v37, %v135_v38  ;;  %s164_s3 = smov 192  ;;  %s173_s8 = smov 3 }
  0x11   :  { %v373_v42 = vld [vmem:[%s736_s0 + $0x9] ss:$16 sm:%s154_s26]   ;;  %v145_v43 = vsel %vm14_vm2, %v371_v39, %v140_v40  ;;  %s428_s9 = smov 80   ;;  %v376_v48 = vld [vmem:[%s736_s0 + $0x8] ss:$16 sm:%s173_s8]   ;;  %s176_s12 = smov 12 }
  0x12   :  { %v157_v44 = vsel %vm6_vm0, %v373_v42, %v372_v41  ;;  %v374_v45 = vld [vmem:[%s736_s0 + $0x9] ss:$16 sm:%s159_s2]   ;;  %146 = vrot.lane.b32.xlu1 %v145_v43, %s428_s9  ;;  %s181_s13 = smov 48  ;;  %s186_s18 = smov 192 }
  0x13   :  { %v375_v46 = vld [vmem:[%s736_s0 + $0x9] ss:$16 sm:%s164_s3]   ;;  %v162_v47 = vsel %vm10_vm1, %v374_v45, %v157_v44  ;;  %v377_v50 = vld [vmem:[%s736_s0 + $0x8] ss:$16 sm:%s176_s12]   ;;  %s429_s19 = smov 72   ;;  %s195_s22 = smov 3 }
  0x14   :  { %v167_v49 = vsel %vm14_vm2, %v375_v46, %v162_v47  ;;  %v378_v51 = vld [vmem:[%s736_s0 + $0x8] ss:$16 sm:%s181_s13]   ;;  %v179_v52 = vsel %vm6_vm0, %v377_v50, %v376_v48  ;;  %s198_s23 = smov 12  ;;  %v380_v55 = vld [vmem:[%s736_s0 + $0x7] ss:$16 sm:%s195_s22]   ;;  %s203_s28 = smov 48 }
  0x15   :  { %168 = vrot.lane.b32.xlu0 %v167_v49, %s429_s19  ;;  %v379_v53 = vld [vmem:[%s736_s0 + $0x8] ss:$16 sm:%s186_s18]   ;;  %v184_v54 = vsel %vm10_vm1, %v378_v51, %v179_v52  ;;  %s208_s29 = smov 192  ;;  %s217_s5 = smov 3 }
  0x16   :  { %v381_v56 = vld [vmem:[%s736_s0 + $0x7] ss:$16 sm:%s198_s23]   ;;  %v189_v57 = vsel %vm14_vm2, %v379_v53, %v184_v54  ;;  %s430_s6 = smov 64   ;;  %v384_v62 = vld [vmem:[%s736_s0 + $0x6] ss:$16 sm:%s217_s5]   ;;  %s220_s9 = smov 12 }
  0x17   :  { %v201_v58 = vsel %vm6_vm0, %v381_v56, %v380_v55  ;;  %v382_v59 = vld [vmem:[%s736_s0 + $0x7] ss:$16 sm:%s203_s28]   ;;  %190 = vrot.lane.b32.xlu1 %v189_v57, %s430_s6  ;;  %s225_s10 = smov 48  ;;  %s230_s15 = smov 192 }
  0x18   :  { %v383_v60 = vld [vmem:[%s736_s0 + $0x7] ss:$16 sm:%s208_s29]   ;;  %v206_v61 = vsel %vm10_vm1, %v382_v59, %v201_v58  ;;  %v385_v0 = vld [vmem:[%s736_s0 + $0x6] ss:$16 sm:%s220_s9]   ;;  %s431_s16 = smov 56   ;;  %s239_s19 = smov 3 }
  0x19   :  { %v211_v63 = vsel %vm14_vm2, %v383_v60, %v206_v61  ;;  %v386_v1 = vld [vmem:[%s736_s0 + $0x6] ss:$16 sm:%s225_s10]   ;;  %v223_v2 = vsel %vm6_vm0, %v385_v0, %v384_v62  ;;  %s242_s20 = smov 12  ;;  %v388_v5 = vld [vmem:[%s736_s0 + $0x5] ss:$16 sm:%s239_s19]   ;;  %s247_s25 = smov 48 }
  0x1a   :  { %212 = vrot.lane.b32.xlu0 %v211_v63, %s431_s16  ;;  %v387_v3 = vld [vmem:[%s736_s0 + $0x6] ss:$16 sm:%s230_s15]   ;;  %v228_v4 = vsel %vm10_vm1, %v386_v1, %v223_v2  ;;  %s252_s26 = smov 192  ;;  %s261_s2 = smov 3 }
  0x1b   :  { %v389_v6 = vld [vmem:[%s736_s0 + $0x5] ss:$16 sm:%s242_s20]   ;;  %v233_v7 = vsel %vm14_vm2, %v387_v3, %v228_v4  ;;  %s432_s3 = smov 48   ;;  %v392_v12 = vld [vmem:[%s736_s0 + $0x4] ss:$16 sm:%s261_s2]   ;;  %s264_s6 = smov 12 }
  0x1c   :  { %v245_v8 = vsel %vm6_vm0, %v389_v6, %v388_v5  ;;  %v390_v9 = vld [vmem:[%s736_s0 + $0x5] ss:$16 sm:%s247_s25]   ;;  %234 = vrot.lane.b32.xlu1 %v233_v7, %s432_s3  ;;  %s269_s7 = smov 48  ;;  %s274_s12 = smov 192 }
  0x1d   :  { %v391_v10 = vld [vmem:[%s736_s0 + $0x5] ss:$16 sm:%s252_s26]   ;;  %v250_v11 = vsel %vm10_vm1, %v390_v9, %v245_v8  ;;  %v393_v14 = vld [vmem:[%s736_s0 + $0x4] ss:$16 sm:%s264_s6]   ;;  %s433_s13 = smov 40   ;;  %s283_s16 = smov 3 }
  0x1e   :  { %v255_v13 = vsel %vm14_vm2, %v391_v10, %v250_v11  ;;  %v394_v15 = vld [vmem:[%s736_s0 + $0x4] ss:$16 sm:%s269_s7]   ;;  %v267_v16 = vsel %vm6_vm0, %v393_v14, %v392_v12  ;;  %s286_s17 = smov 12  ;;  %v396_v19 = vld [vmem:[%s736_s0 + $0x3] ss:$16 sm:%s283_s16]   ;;  %s291_s22 = smov 48 }
  0x1f   :  { %256 = vrot.lane.b32.xlu0 %v255_v13, %s433_s13  ;;  %v395_v17 = vld [vmem:[%s736_s0 + $0x4] ss:$16 sm:%s274_s12]   ;;  %v272_v18 = vsel %vm10_vm1, %v394_v15, %v267_v16  ;;  %s296_s23 = smov 192  ;;  %s305_s28 = smov 3 }
  0x20   :  { %v397_v20 = vld [vmem:[%s736_s0 + $0x3] ss:$16 sm:%s286_s17]   ;;  %v277_v21 = vsel %vm14_vm2, %v395_v17, %v272_v18  ;;  %s434_s29 = smov 32   ;;  %v400_v26 = vld [vmem:[%s736_s0 + $0x2] ss:$16 sm:%s305_s28]   ;;  %s308_s3 = smov 12 }
  0x21   :  { %v289_v22 = vsel %vm6_vm0, %v397_v20, %v396_v19  ;;  %v398_v23 = vld [vmem:[%s736_s0 + $0x3] ss:$16 sm:%s291_s22]   ;;  %278 = vrot.lane.b32.xlu1 %v277_v21, %s434_s29  ;;  %s313_s4 = smov 48  ;;  %s318_s9 = smov 192 }
  0x22   :  { %v399_v24 = vld [vmem:[%s736_s0 + $0x3] ss:$16 sm:%s296_s23]   ;;  %v294_v25 = vsel %vm10_vm1, %v398_v23, %v289_v22  ;;  %v401_v28 = vld [vmem:[%s736_s0 + $0x2] ss:$16 sm:%s308_s3]   ;;  %s435_s10 = smov 24   ;;  %s327_s13 = smov 3 }
  0x23   :  { %v299_v27 = vsel %vm14_vm2, %v399_v24, %v294_v25  ;;  %v402_v29 = vld [vmem:[%s736_s0 + $0x2] ss:$16 sm:%s313_s4]   ;;  %v311_v30 = vsel %vm6_vm0, %v401_v28, %v400_v26  ;;  %s330_s14 = smov 12  ;;  %v404_v33 = vld [vmem:[%s736_s0 + $0x1] ss:$16 sm:%s327_s13]   ;;  %s335_s19 = smov 48 }
  0x24   :  { %300 = vrot.lane.b32.xlu0 %v299_v27, %s435_s10  ;;  %v403_v31 = vld [vmem:[%s736_s0 + $0x2] ss:$16 sm:%s318_s9]   ;;  %v316_v32 = vsel %vm10_vm1, %v402_v29, %v311_v30  ;;  %s340_s20 = smov 192  ;;  %s2_s25 = smov 3 }
  0x25   :  { %v405_v34 = vld [vmem:[%s736_s0 + $0x1] ss:$16 sm:%s330_s14]   ;;  %v321_v35 = vsel %vm14_vm2, %v403_v31, %v316_v32  ;;  %s436_s26 = smov 16   ;;  %s4_s27 = smov 12  ;;  %v3_v40 = vld [vmem:[%s736_s0] ss:$16 sm:%s2_s25]  }
  0x26   :  { %v333_v36 = vsel %vm6_vm0, %v405_v34, %v404_v33  ;;  %v406_v37 = vld [vmem:[%s736_s0 + $0x1] ss:$16 sm:%s335_s19]   ;;  %322 = vrot.lane.b32.xlu1 %v321_v35, %s436_s26  ;;  %s8_s28 = smov 48  ;;  %s12_s2 = smov 192 }
  0x27   :  { %v407_v38 = vld [vmem:[%s736_s0 + $0x1] ss:$16 sm:%s340_s20]   ;;  %v338_v39 = vsel %vm10_vm1, %v406_v37, %v333_v36  ;;  %v5_v42 = vld [vmem:[%s736_s0] ss:$16 sm:%s4_s27]   ;;  %s437_s7 = smov 8  }
  0x28   :  { %v343_v41 = vsel %vm14_vm2, %v407_v38, %v338_v39  ;;  %v9_v43 = vld [vmem:[%s736_s0] ss:$16 sm:%s8_s28]   ;;  %v7_v44 = vsel %vm6_vm0, %v5_v42, %v3_v40  ;;  %vm302_vm0 = vcmask 261312  }
  0x29   :  { %344 = vrot.lane.b32.xlu0 %v343_v41, %s437_s7  ;;  %v13_v45 = vld [vmem:[%s736_s0] ss:$16 sm:%s12_s2]   ;;  %v11_v46 = vsel %vm10_vm1, %v9_v43, %v7_v44  ;;  %vm324_vm1 = vcmask 195712  }
  0x2a   :  { %v15_v47 = vsel %vm14_vm2, %v13_v45, %v11_v46  ;;  %vm346_vm2 = vcmask 130112  }
  0x2b   :  { %17 = vst.msk [vmem:[%s737_s1] sm:$0xff] %vm16_vm3, %v15_v47  }
  0x78   :  { %v37_v48 = vpop.permute.xlu0 %36  }
  0x79   :  { %39 = vst.msk [vmem:[%s737_s1] sm:$0xff] %vm38_vm4, %v37_v48  }
  0x7a   :  { %v81_v49 = vpop.permute.xlu1 %80  }
  0x7d   :  { %v59_v50 = vpop.permute.xlu0 %58  }
  0x7e   :  { %61 = vst.msk [vmem:[%s737_s1] sm:$0xff] %vm60_vm5, %v59_v50  }
  0x7f   :  { %83 = vst.msk [vmem:[%s737_s1] sm:$0xff] %vm82_vm6, %v81_v49   ;;  %v103_v51 = vpop.permute.xlu1 %102  }
  0x80   :  { %105 = vst.msk [vmem:[%s737_s1] sm:$0xff] %vm104_vm7, %v103_v51  }
  0x82   :  { %v125_v52 = vpop.permute.xlu0 %124  }
  0x83   :  { %127 = vst.msk [vmem:[%s737_s1] sm:$0xff] %vm126_vm8, %v125_v52  }
  0x84   :  { %v147_v53 = vpop.permute.xlu1 %146  }
  0x85   :  { %149 = vst.msk [vmem:[%s737_s1] sm:$0xff] %vm148_vm9, %v147_v53  }
  0x87   :  { %v169_v54 = vpop.permute.xlu0 %168  }
  0x88   :  { %171 = vst.msk [vmem:[%s737_s1] sm:$0xff] %vm170_vm10, %v169_v54  }
  0x89   :  { %v191_v55 = vpop.permute.xlu1 %190  }
  0x8a   :  { %193 = vst.msk [vmem:[%s737_s1] sm:$0xff] %vm192_vm11, %v191_v55  }
  0x8c   :  { %v213_v56 = vpop.permute.xlu0 %212  }
  0x8d   :  { %215 = vst.msk [vmem:[%s737_s1] sm:$0xff] %vm214_vm12, %v213_v56  }
  0x8e   :  { %v235_v57 = vpop.permute.xlu1 %234  }
  0x8f   :  { %237 = vst.msk [vmem:[%s737_s1] sm:$0xff] %vm236_vm13, %v235_v57  }
  0x91   :  { %v257_v58 = vpop.permute.xlu0 %256  }
  0x92   :  { %259 = vst.msk [vmem:[%s737_s1] sm:$0xff] %vm258_vm14, %v257_v58  }
  0x93   :  { %v279_v59 = vpop.permute.xlu1 %278  }
  0x94   :  { %281 = vst.msk [vmem:[%s737_s1] sm:$0xff] %vm280_vm15, %v279_v59  }
  0x96   :  { %v301_v60 = vpop.permute.xlu0 %300  }
  0x97   :  { %303 = vst.msk [vmem:[%s737_s1] sm:$0xff] %vm302_vm0, %v301_v60  }
  0x98   :  { %v323_v61 = vpop.permute.xlu1 %322  }
  0x99   :  { %325 = vst.msk [vmem:[%s737_s1] sm:$0xff] %vm324_vm1, %v323_v61  }
  0x9b   :  { %v345_v62 = vpop.permute.xlu0 %344  }
  0x9c   :  { %347 = vst.msk [vmem:[%s737_s1] sm:$0xff] %vm346_vm2, %v345_v62  }

// kernel: double_conv.1
= control target key start
LH: loop header
LB: loop body
LE: loop exit
PB: predicated region body
PF: predicated region fallthrough
CT: control target
= control target key end

     0   :  { %v1361_v0 = vmov 0.0|0.0   ;;  %vm64_vm0 = vcmask 523264   ;;  %vm1362_vm1 = vmmov 0   ;;  %vm186_vm2 = vcmask 1040384   ;;  %s1889_s1 = inlined_call_operand.vmem [shape: f32[192,128], index: 1, kind: input, shape index: {}]   ;;  %s1890_s0 = inlined_call_operand.vmem [shape: f32[32,192], index: 0, kind: input, shape index: {}]   ;;  %s1891_s7 = inlined_call_operand.vmem [shape: f32[128,8], index: 7, kind: input, shape index: {}]   ;;  %s1892_s8 = inlined_call_operand.vmem [shape: f32[8,128], index: 8, kind: input, shape index: {}]   ;;  %s1893_s2 = inlined_call_operand.vmem [shape: f32[384,128], index: 2, kind: input, shape index: {}]   ;;  %s1894_s3 = inlined_call_operand.vmem [shape: f32[1,8], index: 3, kind: input, shape index: {}]   ;;  %s1895_s4 = inlined_call_operand.vmem [shape: f32[1,8], index: 4, kind: input, shape index: {}]   ;;  %s1896_s5 = inlined_call_operand.vmem [shape: f32[1,8], index: 5, kind: input, shape index: {}]   ;;  %s1897_s6 = inlined_call_operand.vmem [shape: f32[1,8], index: 6, kind: input, shape index: {}]   ;;  %s1898_s9 = inlined_call_operand.vmem [shape: f32[32,128], index: 9, kind: output, shape index: {}]  }
   0x1   :  { %1205 = vmatprep.subr.bf16.mxu0 %v1361_v0  ;;  %v40_v1 = vld [vmem:[%s1889_s1] sm:$0xff]  ;;  %v41_v2 = vld [vmem:[%s1889_s1 + $0x8] sm:$0xff]  ;;  %v42_v3 = vld [vmem:[%s1889_s1 + $0x10] sm:$0xff]  ;;  %1241 = vmatprep.subr.bf16.mxu1 %v1361_v0  ;;  %vm310_vm3 = vcmask 64512   ;;  %vm493_vm4 = vcmask 1046528  }
   0x2   :  { %v1206_v4 = vpack.c.bf16 %v41_v2, %v40_v1  ;;  %v43_v5 = vld [vmem:[%s1889_s1 + $0x18] sm:$0xff]  ;;  %v44_v7 = vld [vmem:[%s1889_s1 + $0x20] sm:$0xff]  ;;  %v45_v8 = vld [vmem:[%s1889_s1 + $0x28] sm:$0xff] }
   0x3   :  { %v1209_v6 = vpack.c.bf16 %v43_v5, %v42_v3  ;;  %v1212_v9 = vpack.c.bf16 %v45_v8, %v44_v7  ;;  %v46_v10 = vld [vmem:[%s1889_s1 + $0x30] sm:$0xff]  ;;  %v47_v11 = vld [vmem:[%s1889_s1 + $0x38] sm:$0xff]  ;;  %v33_v12 = vld [vmem:[%s1890_s0 + $0x8] sm:$0xff]  ;;  %v1363_v5 = vmov 0.0  }
   0x4   :  { %1207 = vmatpush1.bf16.msra.mxu0 %v1206_v4  ;;  %967 = vmatprep.mubr.msk.f32.mxu0 %vm64_vm0, %v33_v12  ;;  %v188_v13 = vld [vmem:[%s1891_s7] sm:$0xff]  ;;  %v1215_v14 = vpack.c.bf16 %v47_v11, %v46_v10  ;;  %v189_v15 = vld [vmem:[%s1891_s7 + $0x8] sm:$0xff]  ;;  %v50_v20 = vld [vmem:[%s1889_s1 + $0x50] sm:$0xff] }
   0x5   :  { %1208 = vmatprep.subr.bf16.mxu0 %v1361_v0  ;;  %v48_v16 = vld [vmem:[%s1889_s1 + $0x40] sm:$0xff]  ;;  %v49_v17 = vld [vmem:[%s1889_s1 + $0x48] sm:$0xff]  ;;  %v1460_v18 = vpack.c.bf16 %v189_v15, %v188_v13  ;;  %v51_v21 = vld [vmem:[%s1889_s1 + $0x58] sm:$0xff]  ;;  %1119 = vmatprep.mubr.msk.f32.mxu1 %vm1362_vm1, %v1363_v5 }
   0x6   :  { %v1218_v19 = vpack.c.bf16 %v49_v17, %v48_v16  ;;  %v1221_v22 = vpack.c.bf16 %v51_v21, %v50_v20  ;;  %v52_v23 = vld [vmem:[%s1889_s1 + $0x60] sm:$0xff]  ;;  %v53_v24 = vld [vmem:[%s1889_s1 + $0x68] sm:$0xff]  ;;  %v54_v26 = vld [vmem:[%s1889_s1 + $0x70] sm:$0xff] }
   0x7   :  { %1243 = vmatpush3.bf16.msra.mxu1 %v1460_v18  ;;  %v1224_v25 = vpack.c.bf16 %v53_v24, %v52_v23  ;;  %v55_v27 = vld [vmem:[%s1889_s1 + $0x78] sm:$0xff]  ;;  %v56_v29 = vld [vmem:[%s1889_s1 + $0x80] sm:$0xff]  ;;  %v57_v30 = vld [vmem:[%s1889_s1 + $0x88] sm:$0xff] }
   0x8   :  { %1210 = vmatpush1.bf16.msra.mxu0 %v1209_v6  ;;  %1244 = vmatprep.subr.bf16.mxu1 %v1361_v0  ;;  %v1227_v28 = vpack.c.bf16 %v55_v27, %v54_v26  ;;  %v1230_v31 = vpack.c.bf16 %v57_v30, %v56_v29  ;;  %v58_v32 = vld [vmem:[%s1889_s1 + $0x90] sm:$0xff]  ;;  %v59_v33 = vld [vmem:[%s1889_s1 + $0x98] sm:$0xff]  ;;  %v60_v35 = vld [vmem:[%s1889_s1 + $0xa0] sm:$0xff] }
   0x9   :  { %1211 = vmatprep.subr.bf16.mxu0 %v1361_v0  ;;  %v1233_v34 = vpack.c.bf16 %v59_v33, %v58_v32  ;;  %v61_v36 = vld [vmem:[%s1889_s1 + $0xa8] sm:$0xff]  ;;  %v62_v38 = vld [vmem:[%s1889_s1 + $0xb0] sm:$0xff]  ;;  %v63_v39 = vld [vmem:[%s1889_s1 + $0xb8] sm:$0xff] }
   0xa   :  { %v1236_v37 = vpack.c.bf16 %v61_v36, %v60_v35  ;;  %v1239_v40 = vpack.c.bf16 %v63_v39, %v62_v38  ;;  %v32_v41 = vld [vmem:[%s1890_s0] sm:$0xff]  ;;  %v35_v42 = vld [vmem:[%s1890_s0 + $0x18] sm:$0xff]  ;;  %v34_v43 = vld [vmem:[%s1890_s0 + $0x10] sm:$0xff] }
   0xb   :  { %v37_v44 = vld [vmem:[%s1890_s0 + $0x28] sm:$0xff]  ;;  %v36_v45 = vld [vmem:[%s1890_s0 + $0x20] sm:$0xff]  ;;  %v39_v46 = vld [vmem:[%s1890_s0 + $0x38] sm:$0xff] }
   0xc   :  { %1213 = vmatpush1.bf16.msra.mxu0 %v1212_v9  ;;  %v38_v47 = vld [vmem:[%s1890_s0 + $0x30] sm:$0xff]  ;;  %v191_v49 = vld [vmem:[%s1891_s7 + $0x18] sm:$0xff]  ;;  %v192_v51 = vld [vmem:[%s1891_s7 + $0x20] sm:$0xff] }
   0xd   :  { %1214 = vmatprep.subr.bf16.mxu0 %v1361_v0  ;;  %v190_v48 = vld [vmem:[%s1891_s7 + $0x10] sm:$0xff]  ;;  %v193_v52 = vld [vmem:[%s1891_s7 + $0x28] sm:$0xff]  ;;  %v195_v55 = vld [vmem:[%s1891_s7 + $0x38] sm:$0xff] }
   0xe   :  { %v1544_v50 = vpack.c.bf16 %v191_v49, %v190_v48  ;;  %v1554_v53 = vpack.c.bf16 %v193_v52, %v192_v51  ;;  %v194_v54 = vld [vmem:[%s1891_s7 + $0x30] sm:$0xff]  ;;  %v196_v57 = vld [vmem:[%s1891_s7 + $0x40] sm:$0xff]  ;;  %v197_v58 = vld [vmem:[%s1891_s7 + $0x48] sm:$0xff] }
   0xf   :  { %v1564_v56 = vpack.c.bf16 %v195_v55, %v194_v54  ;;  %v1574_v59 = vpack.c.bf16 %v197_v58, %v196_v57  ;;  %v198_v60 = vld [vmem:[%s1891_s7 + $0x50] sm:$0xff]  ;;  %v199_v61 = vld [vmem:[%s1891_s7 + $0x58] sm:$0xff]  ;;  %v200_v63 = vld [vmem:[%s1891_s7 + $0x60] sm:$0xff] }
  0x10   :  { %1216 = vmatpush1.bf16.msra.mxu0 %v1215_v14  ;;  %1246 = vmatpush3.bf16.msra.mxu1 %v1544_v50  ;;  %v1584_v62 = vpack.c.bf16 %v199_v61, %v198_v60  ;;  %v201_v1 = vld [vmem:[%s1891_s7 + $0x68] sm:$0xff]  ;;  %v202_v3 = vld [vmem:[%s1891_s7 + $0x70] sm:$0xff]  ;;  %v203_v4 = vld [vmem:[%s1891_s7 + $0x78] sm:$0xff] }
  0x11   :  { %1217 = vmatprep.subr.bf16.mxu0 %v1361_v0  ;;  %1247 = vmatprep.subr.bf16.mxu1 %v1361_v0  ;;  %v1594_v2 = vpack.c.bf16 %v201_v1, %v200_v63  ;;  %v1605_v6 = vpack.c.bf16 %v203_v4, %v202_v3  ;;  %v1636_v39 = vld [vmem:[%s1892_s8] sm:$0xff]  ;;  %v555_v51 = vld [vmem:[%s1893_s2 + $0x128] sm:$0xff]  ;;  %v556_v54 = vld [vmem:[%s1893_s2 + $0x130] sm:$0xff] }
  0x12   :  { %v554_v49 = vld [vmem:[%s1893_s2 + $0x120] sm:$0xff]  ;;  %v557_v55 = vld [vmem:[%s1893_s2 + $0x138] sm:$0xff]  ;;  %v559_v60 = vld [vmem:[%s1893_s2 + $0x148] sm:$0xff] }
  0x13   :  { %v1305_v52 = vpack.c.bf16 %v555_v51, %v554_v49  ;;  %v1309_v57 = vpack.c.bf16 %v557_v55, %v556_v54  ;;  %v558_v58 = vld [vmem:[%s1893_s2 + $0x140] sm:$0xff]  ;;  %v541_v49 = vld [vmem:[%s1893_s2 + $0xb8] sm:$0xff]  ;;  %v524_v54 = vld [vmem:[%s1893_s2 + $0x30] sm:$0xff] }
  0x14   :  { %1219 = vmatpush1.bf16.msra.mxu0 %v1218_v19  ;;  %1249 = vmatpush3.bf16.msra.mxu1 %v1554_v53  ;;  %v1313_v61 = vpack.c.bf16 %v559_v60, %v558_v58  ;;  %v525_v55 = vld [vmem:[%s1893_s2 + $0x38] sm:$0xff]  ;;  %v543_v58 = vld [vmem:[%s1893_s2 + $0xc8] sm:$0xff] }
  0x15   :  { %1220 = vmatprep.subr.bf16.mxu0 %v1361_v0  ;;  %1250 = vmatprep.subr.bf16.mxu1 %v1361_v0  ;;  %v1279_v60 = vpack.c.bf16 %v525_v55, %v524_v54 }
  0x18   :  { %1222 = vmatpush1.bf16.msra.mxu0 %v1221_v22  ;;  %1252 = vmatpush3.bf16.msra.mxu1 %v1564_v56 }
  0x19   :  { %1223 = vmatprep.subr.bf16.mxu0 %v1361_v0  ;;  %1253 = vmatprep.subr.bf16.mxu1 %v1361_v0 }
  0x1c   :  { %1225 = vmatpush1.bf16.msra.mxu0 %v1224_v25  ;;  %1255 = vmatpush3.bf16.msra.mxu1 %v1574_v59 }
  0x1d   :  { %1226 = vmatprep.subr.bf16.mxu0 %v1361_v0  ;;  %1256 = vmatprep.subr.bf16.mxu1 %v1361_v0 }
  0x20   :  { %1228 = vmatpush1.bf16.msra.mxu0 %v1227_v28  ;;  %1258 = vmatpush3.bf16.msra.mxu1 %v1584_v62 }
  0x21   :  { %1229 = vmatprep.subr.bf16.mxu0 %v1361_v0  ;;  %1259 = vmatprep.subr.bf16.mxu1 %v1361_v0 }
  0x24   :  { %1231 = vmatpush1.bf16.msra.mxu0 %v1230_v31  ;;  %1261 = vmatpush3.bf16.msra.mxu1 %v1594_v2 }
  0x25   :  { %1232 = vmatprep.subr.bf16.mxu0 %v1361_v0  ;;  %1262 = vmatprep.subr.bf16.mxu1 %v1361_v0 }
  0x28   :  { %1234 = vmatpush1.bf16.msra.mxu0 %v1233_v34  ;;  %1264 = vmatpush3.bf16.msra.mxu1 %v1605_v6 }
  0x29   :  { %1235 = vmatprep.subr.bf16.mxu0 %v1361_v0  ;;  %1122 = vmatprep.subr.mxu1 %v1363_v5 }
  0x2c   :  { %1237 = vmatpush1.bf16.msra.mxu0 %v1236_v37 }
  0x2d   :  { %1238 = vmatprep.subr.bf16.mxu0 %v1361_v0 }
  0x30   :  { %1240 = vmatpush1.bf16.msra.mxu0 %v1239_v40  ;;  %v534_v40 = vld [vmem:[%s1893_s2 + $0x80] sm:$0xff] }
  0x33   :  { %142 = vmatmul.mubr.f32.vlgmr.msra.gmra.mrb[0].mxu0 %v32_v41  ;;  %v535_v41 = vld [vmem:[%s1893_s2 + $0x88] sm:$0xff] }
  0x34   :  { %968 = vmatprep.mubr.msk.f32.mxu0 %vm64_vm0, %v35_v42  ;;  %v1265_v42 = vpack.c.bf16 %v535_v41, %v534_v40  ;;  %v521_v40 = vld [vmem:[%s1893_s2 + $0x18] sm:$0xff] }
  0x37   :  { %147 = vmatmul.mubr.f32.gmra.mrb[2].mxu0 %v34_v43  ;;  %v550_v43 = vld [vmem:[%s1893_s2 + $0x100] sm:$0xff] }
  0x38   :  { %969 = vmatprep.mubr.msk.f32.mxu0 %vm64_vm0, %v37_v44  ;;  %v551_v44 = vld [vmem:[%s1893_s2 + $0x108] sm:$0xff] }
  0x3b   :  { %152 = vmatmul.mubr.f32.gmra.mrb[4].mxu0 %v36_v45  ;;  %v1297_v45 = vpack.c.bf16 %v551_v44, %v550_v43  ;;  %v539_v43 = vld [vmem:[%s1893_s2 + $0xa8] sm:$0xff] }
  0x3c   :  { %970 = vmatprep.mubr.msk.f32.mxu0 %vm64_vm0, %v39_v46  ;;  %v552_v46 = vld [vmem:[%s1893_s2 + $0x110] sm:$0xff] }
  0x3d   :  { %1298 = vmatprep.subr.bf16.mxu0 %v1297_v45 }
  0x3e   :  { %1300 = vmatpush3.bf16.msra.mxu0 %v1297_v45 }
  0x3f   :  { %157 = vmatmul.mubr.f32.gmra.mrb[6].mxu0 %v38_v47  ;;  %v553_v47 = vld [vmem:[%s1893_s2 + $0x118] sm:$0xff] }
  0x40   :  { %v1301_v48 = vpack.c.bf16 %v553_v47, %v552_v46  ;;  %v522_v46 = vld [vmem:[%s1893_s2 + $0x20] sm:$0xff]  ;;  %v523_v47 = vld [vmem:[%s1893_s2 + $0x28] sm:$0xff] }
  0x41   :  { %v1275_v51 = vpack.c.bf16 %v523_v47, %v522_v46 }
  0x42   :  { %1302 = vmatprep.subr.bf16.mxu0 %v1301_v48 }
  0x43   :  { %1304 = vmatpush3.bf16.msra.mxu0 %v1301_v48  ;;  %v540_v48 = vld [vmem:[%s1893_s2 + $0xb0] sm:$0xff] }
  0x44   :  { %1306 = vmatprep.subr.bf16.mxu0 %v1305_v52 }
  0x47   :  { %1308 = vmatpush3.bf16.msra.mxu0 %v1305_v52  ;;  %v1277_v52 = vpack.c.bf16 %v541_v49, %v540_v48 }
  0x48   :  { %1310 = vmatprep.subr.bf16.mxu0 %v1309_v57 }
  0x4b   :  { %1312 = vmatpush3.bf16.msra.mxu0 %v1309_v57  ;;  %v542_v57 = vld [vmem:[%s1893_s2 + $0xc0] sm:$0xff] }
  0x4c   :  { %1314 = vmatprep.subr.bf16.mxu0 %v1313_v61 }
  0x4f   :  { %1316 = vmatpush3.bf16.msra.mxu0 %v1313_v61  ;;  %v1281_v61 = vpack.c.bf16 %v543_v58, %v542_v57 }
 0x106   :  { %v1610_v7 = vpop.f32.mrb[0].mxu0 }
 0x107   :  { %v145_v8 = vpop.f32.mrb[1].mxu0  ;;  %v173_v10 = vmul.f32 %v1610_v7, %v1610_v7 }
 0x10a   :  { %v1612_v9 = vpop.f32.mrb[2].mxu0 }
 0x10b   :  { %v164_v11 = vadd.f32 %v1612_v9, %v1610_v7  ;;  %v174_v12 = vmul.f32 %v1612_v9, %v1612_v9  ;;  %v150_v13 = vpop.f32.mrb[3].mxu0 }
 0x10d   :  { %v177_v14 = vadd.f32 %v174_v12, %v173_v10  ;;  %v1364_v12 = vmov 1966171168  }
 0x10e   :  { %v1620_v15 = vpop.f32.mrb[4].mxu0  ;;  %v284_v13 = vunpack.c.l.s4 %v1364_v12  ;;  %v529_v12 = vld [vmem:[%s1893_s2 + $0x58] sm:$0xff] }
 0x10f   :  { %v165_v16 = vadd.f32 %v164_v11, %v1620_v15  ;;  %v175_v17 = vmul.f32 %v1620_v15, %v1620_v15  ;;  %v155_v19 = vpop.f32.mrb[5].mxu0 }
 0x111   :  { %v178_v20 = vadd.f32 %v177_v14, %v175_v17  ;;  %v286_v14 = vlaneseq }
 0x112   :  { %v1625_v21 = vpop.f32.mrb[6].mxu0 }
 0x113   :  { %v166_v22 = vadd.f32 %v165_v16, %v1625_v21  ;;  %v176_v23 = vmul.f32 %v1625_v21, %v1625_v21  ;;  %v160_v24 = vpop.f32.mrb[7].mxu0  ;;  %v285_v16 = vunpack.c.0.s8 %v284_v13  ;;  %v1675_v17 = vshrl.u32 %v286_v14, 7  ;;  %v560_v13 = vld [vmem:[%s1893_s2 + $0x150] sm:$0xff] }
 0x114   :  { %v162_v24 = vld [vmem:[%s1894_s3] sm:$0x1] }
 0x115   :  { %v167_v25 = vrot.slane %v166_v22, 4  ;;  %v179_v26 = vadd.f32 %v178_v20, %v176_v23  ;;  %v1678_v19 = vsub.s32 %v285_v16, %v1675_v17  ;;  %v561_v16 = vld [vmem:[%s1893_s2 + $0x158] sm:$0xff]  ;;  %v413_v54 = vand.u32 15, %v1675_v17 }
 0x116   :  { %v408_v57 = vadd.s32 24, %v1675_v17 }
 0x117   :  { %v168_v27 = vadd.f32 %v167_v25, %v166_v22  ;;  %v180_v28 = vrot.slane %v179_v26, 4  ;;  %vm1815_vm5 = vcmp.ne.s32.totalorder %v413_v54, 0 }
 0x119   :  { %v169_v29 = vrot.slane %v168_v27, 2  ;;  %v181_v30 = vadd.f32 %v180_v28, %v179_v26 }
 0x11b   :  { %v170_v31 = vadd.f32 %v169_v29, %v168_v27  ;;  %v182_v32 = vrot.slane %v181_v30, 2  ;;  %v163_v27 = vld [vmem:[%s1895_s4] sm:$0x1]  ;;  %v1689_v29 = vsub.s32 0, %v1675_v17 }
 0x11d   :  { %v171_v33 = vrot.slane %v170_v31, 1  ;;  %v183_v34 = vadd.f32 %v182_v32, %v181_v30  ;;  %v518_v30 = vld [vmem:[%s1893_s2] sm:$0xff] }
 0x11f   :  { %v184_v35 = vrot.slane %v183_v34, 1  ;;  %v172_v36 = vadd.f32 %v171_v33, %v170_v31  ;;  %v519_v31 = vld [vmem:[%s1893_s2 + $0x8] sm:$0xff]  ;;  %v536_v33 = vld [vmem:[%s1893_s2 + $0x90] sm:$0xff] }
 0x121   :  { %v185_v37 = vadd.f32 %v184_v35, %v183_v34  ;;  %v537_v34 = vld [vmem:[%s1893_s2 + $0x98] sm:$0xff] }
 0x123   :  { %v187_v38 = vsel %vm186_vm2, %v172_v36, %v185_v37  ;;  %v1267_v36 = vpack.c.bf16 %v519_v31, %v518_v30  ;;  %v1269_v37 = vpack.c.bf16 %v537_v34, %v536_v33  ;;  %v563_v30 = vld [vmem:[%s1893_s2 + $0x168] sm:$0xff]  ;;  %v549_v33 = vld [vmem:[%s1893_s2 + $0xf8] sm:$0xff] }
 0x124   :  { %1120 = vmatmul.mubr.f32.vlgmr.msra.gmra.mrb[0].mxu1 %v187_v38  ;;  %v520_v38 = vld [vmem:[%s1893_s2 + $0x10] sm:$0xff] }
 0x125   :  { %1124 = vmatprep.mubr.msk.f32.mxu1 %vm1362_vm1, %v1363_v5  ;;  %1123 = vmatpush3.msra.mxu1 %v1636_v39  ;;  %v1271_v44 = vpack.c.bf16 %v521_v40, %v520_v38  ;;  %v565_v40 = vld [vmem:[%s1893_s2 + $0x178] sm:$0xff] }
 0x126   :  { %1266 = vmatprep.subr.bf16.mxu1 %v1265_v42  ;;  %v538_v42 = vld [vmem:[%s1893_s2 + $0xa0] sm:$0xff] }
 0x127   :  { %v1273_v45 = vpack.c.bf16 %v539_v43, %v538_v42  ;;  %v394_v42 = vsub.s32 1, %v1675_v17 }
 0x1f7   :  { %v270_v63 = vpop.f32.mrb[0].mxu1 }
 0x1f8   :  { %v274_v1 = vmul.f32 0.001953125, %v270_v63  ;;  %v1121_v3 = vpop.f32.mrb[1].mxu1  ;;  %v526_v63 = vld [vmem:[%s1893_s2 + $0x40] sm:$0xff] }
 0x1fa   :  { %v275_v4 = vmul.f32 %v274_v1, %v274_v1 }
 0x1fc   :  { %v277_v8 = vrot.slane %v275_v4, 7  ;;  %v544_v4 = vld [vmem:[%s1893_s2 + $0xd0] sm:$0xff] }
 0x1fe   :  { %v279_v10 = vsub.f32 %v274_v1, %v277_v8  ;;  %v545_v8 = vld [vmem:[%s1893_s2 + $0xd8] sm:$0xff] }
 0x200   :  { %v280_v11 = vadd.f32 1e-05, %v279_v10  ;;  %v1285_v10 = vpack.c.bf16 %v545_v8, %v544_v4  ;;  %v407_v8 = vadd.s32 16, %v1675_v17 }
 0x202   :  { %1357 = vrsqrt.f32 %v280_v11  ;;  %v528_v11 = vld [vmem:[%s1893_s2 + $0x50] sm:$0xff] }
 0x203   :  { %v1287_v14 = vpack.c.bf16 %v529_v12, %v528_v11 }
 0x20c   :  { %v1358_v20 = vpop.eup %1357 }
 0x20d   :  { %v289_v22 = vrot.slane %v1358_v20, %v1678_v19  ;;  %v1317_v20 = vpack.c.bf16 %v561_v16, %v560_v13 }
 0x20f   :  { %v290_v23 = vcombine.high %v289_v22, %v289_v22  ;;  %v546_v22 = vld [vmem:[%s1893_s2 + $0xe0] sm:$0xff]  ;;  %1318 = vmatprep.subr.bf16.mxu0 %v1317_v20 }
 0x210   :  { %1320 = vmatpush3.bf16.msra.mxu0 %v1317_v20 }
 0x211   :  { %v297_v25 = vrot.slane %v290_v23, %v1678_v19  ;;  %v547_v23 = vld [vmem:[%s1893_s2 + $0xe8] sm:$0xff] }
 0x213   :  { %v299_v26 = vmul.f32 %v297_v25, %v162_v24  ;;  %v1289_v24 = vpack.c.bf16 %v547_v23, %v546_v22  ;;  %v530_v25 = vld [vmem:[%s1893_s2 + $0x60] sm:$0xff] }
 0x215   :  { %v300_v28 = vmul.f32 %v299_v26, %v274_v1  ;;  %v527_v1 = vld [vmem:[%s1893_s2 + $0x48] sm:$0xff] }
 0x216   :  { %v1283_v3 = vpack.c.bf16 %v527_v1, %v526_v63 }
 0x217   :  { %v301_v32 = vsub.f32 %v163_v27, %v300_v28  ;;  %v562_v27 = vld [vmem:[%s1893_s2 + $0x160] sm:$0xff] }
 0x218   :  { %v1321_v31 = vpack.c.bf16 %v563_v30, %v562_v27  ;;  %v427_v30 = vand.u32 15, %v407_v8 }
 0x219   :  { %v306_v35 = vrot.slane %v301_v32, %v1689_v29  ;;  %v548_v32 = vld [vmem:[%s1893_s2 + $0xf0] sm:$0xff] }
 0x21a   :  { %1322 = vmatprep.subr.bf16.mxu0 %v1321_v31  ;;  %v1293_v34 = vpack.c.bf16 %v549_v33, %v548_v32  ;;  %vm982_vm8 = vcmp.ne.s32.totalorder %v427_v30, 0 }
 0x21b   :  { %v308_v41 = vsel %vm186_vm2, %v299_v26, %v306_v35  ;;  %v531_v26 = vld [vmem:[%s1893_s2 + $0x68] sm:$0xff]  ;;  %v532_v35 = vld [vmem:[%s1893_s2 + $0x70] sm:$0xff]  ;;  %1324 = vmatpush3.bf16.msra.mxu0 %v1321_v31 }
 0x21c   :  { %1125 = vmatmul.mubr.msk.f32.vlgmr.msra.gmra.mrb[2].mxu1 %vm310_vm3, %v308_v41  ;;  %v1291_v28 = vpack.c.bf16 %v531_v26, %v530_v25 }
 0x21d   :  { %1268 = vmatpush3.bf16.msra.mxu1 %v1267_v36  ;;  %v533_v36 = vld [vmem:[%s1893_s2 + $0x78] sm:$0xff] }
 0x21e   :  { %1270 = vmatprep.subr.bf16.mxu1 %v1269_v37  ;;  %v564_v37 = vld [vmem:[%s1893_s2 + $0x170] sm:$0xff]  ;;  %v1295_v38 = vpack.c.bf16 %v533_v36, %v532_v35 }
 0x21f   :  { %v1325_v41 = vpack.c.bf16 %v565_v40, %v564_v37 }
 0x221   :  { %1272 = vmatpush3.bf16.msra.mxu1 %v1271_v44  ;;  %1326 = vmatprep.subr.bf16.mxu0 %v1325_v41  ;;  %v406_v44 = vadd.s32 8, %v1675_v17 }
 0x222   :  { %1274 = vmatprep.subr.bf16.mxu1 %v1273_v45  ;;  %1328 = vmatpush3.bf16.msra.mxu0 %v1325_v41 }
 0x223   :  { %1200 = vmatprep.subr.mxu0 %v1363_v5  ;;  %v420_v55 = vand.u32 15, %v406_v44 }
 0x225   :  { %1276 = vmatpush3.bf16.msra.mxu1 %v1275_v51  ;;  %vm1819_vm6 = vcmp.ne.s32.totalorder %v420_v55, 15 }
 0x226   :  { %1278 = vmatprep.subr.bf16.mxu1 %v1277_v52 }
 0x229   :  { %1280 = vmatpush3.bf16.msra.mxu1 %v1279_v60 }
 0x22a   :  { %1282 = vmatprep.subr.bf16.mxu1 %v1281_v61 }
 0x22d   :  { %1284 = vmatpush3.bf16.msra.mxu1 %v1283_v3 }
 0x22e   :  { %1286 = vmatprep.subr.bf16.mxu1 %v1285_v10 }
 0x231   :  { %1288 = vmatpush3.bf16.msra.mxu1 %v1287_v14 }
 0x232   :  { %1290 = vmatprep.subr.bf16.mxu1 %v1289_v24 }
 0x235   :  { %1292 = vmatpush3.bf16.msra.mxu1 %v1291_v28 }
 0x236   :  { %1294 = vmatprep.subr.bf16.mxu1 %v1293_v34 }
 0x239   :  { %1296 = vmatpush3.bf16.msra.mxu1 %v1295_v38 }
 0x23a   :  { %1329 = vmatprep.subr.bf16.mxu1 %v1361_v0 }
 0x2ef   :  { %v380_v43 = vpop.f32.mrb[2].mxu1 }
 0x2f0   :  { %v387_v45 = vrot.slane %v380_v43, %v1689_v29  ;;  %v1126_v46 = vpop.f32.mrb[3].mxu1  ;;  %v395_v47 = vrot.slane %v380_v43, %v394_v42 }
 0x2f2   :  { %v389_v48 = vmul.f32 %v387_v45, %v1612_v9  ;;  %v390_v49 = vmul.f32 %v387_v45, %v1620_v15  ;;  %v391_v51 = vmul.f32 %v387_v45, %v1625_v21  ;;  %v388_v52 = vmul.f32 %v387_v45, %v1610_v7 }
 0x2f3   :  { %v434_v21 = vand.u32 15, %v408_v57 }
 0x2f4   :  { %v397_v58 = vadd.f32 %v395_v47, %v389_v48  ;;  %v398_v60 = vadd.f32 %v395_v47, %v390_v49  ;;  %v399_v61 = vadd.f32 %v395_v47, %v391_v51  ;;  %v396_v63 = vadd.f32 %v395_v47, %v388_v52 }
 0x2f5   :  { %vm984_vm7 = vcmp.ne.s32.totalorder %v434_v21, 15 }
 0x2f6   :  { %v401_v1 = vmax.f32 %v397_v58, 0.0  ;;  %v402_v3 = vmax.f32 %v398_v60, 0.0  ;;  %v403_v4 = vmax.f32 %v399_v61, 0.0  ;;  %v400_v9 = vmax.f32 %v396_v63, 0.0 }
 0x2f8   :  { %630 = vmatprep.mubr.f32.mxu1 %v400_v9  ;;  %v465_v10 = vrot.slane %v400_v9, 7  ;;  %v494_v11 = vrot.slane %v400_v9, 1  ;;  %v495_v12 = vrot.slane %v401_v1, 1  ;;  %v497_v13 = vrot.slane %v402_v3, 1 }
 0x2f9   :  { %v499_v14 = vrot.slane %v403_v4, 1  ;;  %v466_v16 = vrot.slane %v401_v1, 7  ;;  %v468_v20 = vrot.slane %v402_v3, 7  ;;  %v470_v22 = vrot.slane %v403_v4, 7 }
 0x2fa   :  { %v476_v23 = vsel %vm186_vm2, 0.0, %v465_v10  ;;  %v496_v24 = vsel %vm493_vm4, %v494_v11, %v495_v12  ;;  %v498_v25 = vsel %vm493_vm4, %v495_v12, %v497_v13 }
 0x2fb   :  { %973 = vmatmul.mubr.msk.f32.vlgmr.msra.gmra.mrb[4].mxu1 %vm1815_vm5, %v476_v23  ;;  %1159 = vmatprep.mubr.f32.mxu0 %v496_v24  ;;  %v500_v26 = vsel %vm493_vm4, %v497_v13, %v499_v14  ;;  %v467_v27 = vsel %vm186_vm2, %v465_v10, %v466_v16  ;;  %v469_v28 = vsel %vm186_vm2, %v466_v16, %v468_v20  ;;  %v505_v32 = vsel %vm493_vm4, %v499_v14, 0.0 }
 0x2fc   :  { %635 = vmatprep.mubr.f32.mxu1 %v401_v1  ;;  %1160 = vmatmul.mubr.msk.f32.vlgmr.msra.gmra.mrb[8].mxu0 %vm1819_vm6, %v498_v25  ;;  %v471_v31 = vsel %vm186_vm2, %v468_v20, %v470_v22  ;;  %v736_v25 = vld [vmem:[%s1896_s5] sm:$0x1] }
 0x2fd   :  { %1162 = vmatprep.mubr.f32.mxu0 %v500_v26  ;;  %1331 = vmatpush3.bf16.msra.mxu1 %v1460_v18 }
 0x2fe   :  { %1332 = vmatprep.subr.bf16.mxu1 %v1361_v0  ;;  %1201 = vmatpush3.msra.mxu0 %v1636_v39 }
 0x2ff   :  { %636 = vmatmul.mubr.f32.gmra.mrb[6].mxu1 %v467_v27 }
 0x300   :  { %640 = vmatprep.mubr.f32.mxu1 %v402_v3  ;;  %1163 = vmatmul.mubr.msk.f32.gmra.mrb[10].mxu0 %vm984_vm7, %v505_v32 }
 0x301   :  { %1334 = vmatpush3.bf16.msra.mxu1 %v1544_v50  ;;  %1202 = vmatprep.mubr.msk.f32.mxu0 %vm1362_vm1, %v1363_v5 }
 0x302   :  { %1335 = vmatprep.subr.bf16.mxu1 %v1361_v0 }
 0x303   :  { %975 = vmatmul.mubr.msk.f32.gmra.mrb[8].mxu1 %vm982_vm8, %v469_v28  ;;  %v737_v28 = vld [vmem:[%s1897_s6] sm:$0x1] }
 0x304   :  { %645 = vmatprep.mubr.f32.mxu1 %v403_v4 }
 0x305   :  { %1337 = vmatpush3.bf16.msra.mxu1 %v1554_v53 }
 0x306   :  { %1338 = vmatprep.subr.bf16.mxu1 %v1361_v0 }
 0x307   :  { %646 = vmatmul.mubr.f32.gmra.mrb[10].mxu1 %v471_v31 }
 0x308   :  { %1197 = vmatprep.mubr.msk.f32.mxu1 %vm1362_vm1, %v1363_v5 }
 0x309   :  { %1340 = vmatpush3.bf16.msra.mxu1 %v1564_v56 }
 0x30a   :  { %1341 = vmatprep.subr.bf16.mxu1 %v1361_v0 }
 0x30d   :  { %1343 = vmatpush3.bf16.msra.mxu1 %v1574_v59 }
 0x30e   :  { %1344 = vmatprep.subr.bf16.mxu1 %v1361_v0 }
 0x311   :  { %1346 = vmatpush3.bf16.msra.mxu1 %v1584_v62 }
 0x312   :  { %1347 = vmatprep.subr.bf16.mxu1 %v1361_v0 }
 0x315   :  { %1349 = vmatpush3.bf16.msra.mxu1 %v1594_v2 }
 0x316   :  { %1350 = vmatprep.subr.bf16.mxu1 %v1361_v0 }
 0x319   :  { %1352 = vmatpush3.bf16.msra.mxu1 %v1605_v6 }
 0x3ce   :  { %v1036_v18 = vpop.f32.mrb[4].mxu1 }
 0x3cf   :  { %v1037_v50 = vpop.f32.mrb[5].mxu1  ;;  %v1161_v53 = vpop.f32.mrb[8].mxu0 }
 0x3d0   :  { %v1038_v56 = vadd.f32 %v1037_v50, %v1036_v18  ;;  %v717_v5 = vpop.f32.mrb[9].mxu0 }
 0x3d2   :  { %v1856_v39 = vadd.f32 %v1038_v56, %v717_v5  ;;  %v1039_v59 = vpop.f32.mrb[6].mxu1 }
 0x3d3   :  { %v1040_v33 = vpop.f32.mrb[7].mxu1  ;;  %v1164_v34 = vpop.f32.mrb[10].mxu0 }
 0x3d4   :  { %v1041_v35 = vadd.f32 %v1040_v33, %v1039_v59  ;;  %v727_v62 = vpop.f32.mrb[11].mxu0  ;;  %v747_v43 = vmul.f32 %v1856_v39, %v1856_v39 }
 0x3d6   :  { %v723_v36 = vadd.f32 %v1161_v53, %v1041_v35  ;;  %v1042_v37 = vpop.f32.mrb[8].mxu1 }
 0x3d7   :  { %v1043_v38 = vpop.f32.mrb[9].mxu1 }
 0x3d8   :  { %v1044_v2 = vadd.f32 %v1043_v38, %v1042_v37  ;;  %v748_v40 = vmul.f32 %v723_v36, %v723_v36  ;;  %v738_v44 = vadd.f32 %v723_v36, %v1856_v39 }
 0x3da   :  { %v728_v0 = vadd.f32 %v1044_v2, %v727_v62  ;;  %v1045_v41 = vpop.f32.mrb[10].mxu1  ;;  %v751_v47 = vadd.f32 %v748_v40, %v747_v43 }
 0x3db   :  { %v1046_v6 = vpop.f32.mrb[11].mxu1 }
 0x3dc   :  { %v749_v45 = vmul.f32 %v728_v0, %v728_v0  ;;  %v1047_v46 = vadd.f32 %v1046_v6, %v1045_v41  ;;  %v739_v48 = vadd.f32 %v738_v44, %v728_v0 }
 0x3de   :  { %v733_v49 = vadd.f32 %v1164_v34, %v1047_v46  ;;  %v752_v51 = vadd.f32 %v751_v47, %v749_v45 }
 0x3e0   :  { %v740_v52 = vadd.f32 %v739_v48, %v733_v49  ;;  %v750_v54 = vmul.f32 %v733_v49, %v733_v49 }
 0x3e2   :  { %v741_v55 = vrot.slane %v740_v52, 4  ;;  %v753_v57 = vadd.f32 %v752_v51, %v750_v54 }
 0x3e4   :  { %v742_v58 = vadd.f32 %v741_v55, %v740_v52  ;;  %v754_v60 = vrot.slane %v753_v57, 4 }
 0x3e6   :  { %v743_v61 = vrot.slane %v742_v58, 2  ;;  %v755_v63 = vadd.f32 %v754_v60, %v753_v57 }
 0x3e8   :  { %v744_v1 = vadd.f32 %v743_v61, %v742_v58  ;;  %v756_v3 = vrot.slane %v755_v63, 2 }
 0x3ea   :  { %v745_v4 = vrot.slane %v744_v1, 1  ;;  %v757_v9 = vadd.f32 %v756_v3, %v755_v63 }
 0x3ec   :  { %v758_v15 = vrot.slane %v757_v9, 1  ;;  %v746_v7 = vadd.f32 %v745_v4, %v744_v1 }
 0x3ee   :  { %v759_v21 = vadd.f32 %v758_v15, %v757_v9 }
 0x3f0   :  { %v760_v8 = vsel %vm186_vm2, %v746_v7, %v759_v21 }
 0x3f1   :  { %1198 = vmatmul.mubr.f32.vlgmr.msra.gmra.mrb[12].mxu1 %v760_v8 }
 0x4c4   :  { %v827_v10 = vpop.f32.mrb[12].mxu1 }
 0x4c5   :  { %v831_v11 = vmul.f32 0.001953125, %v827_v10  ;;  %v1199_v12 = vpop.f32.mrb[13].mxu1 }
 0x4c7   :  { %v832_v13 = vmul.f32 %v831_v11, %v831_v11 }
 0x4c9   :  { %v834_v14 = vrot.slane %v832_v13, 7 }
 0x4cb   :  { %v836_v16 = vsub.f32 %v831_v11, %v834_v14 }
 0x4cd   :  { %v837_v20 = vadd.f32 1e-05, %v836_v16 }
 0x4cf   :  { %1359 = vrsqrt.f32 %v837_v20 }
 0x4d9   :  { %v1360_v22 = vpop.eup %1359 }
 0x4da   :  { %v846_v23 = vrot.slane %v1360_v22, %v1678_v19 }
 0x4dc   :  { %v847_v24 = vcombine.high %v846_v23, %v846_v23 }
 0x4de   :  { %v854_v26 = vrot.slane %v847_v24, %v1678_v19 }
 0x4e0   :  { %v856_v27 = vmul.f32 %v854_v26, %v736_v25 }
 0x4e2   :  { %v857_v30 = vmul.f32 %v856_v27, %v831_v11 }
 0x4e4   :  { %v858_v31 = vsub.f32 %v737_v28, %v857_v30 }
 0x4e6   :  { %v863_v32 = vrot.slane %v858_v31, %v1689_v29 }
 0x4e8   :  { %v865_v18 = vsel %vm186_vm2, %v856_v27, %v863_v32 }
 0x4e9   :  { %1203 = vmatmul.mubr.msk.f32.vlgmr.msra.gmra.mrb[12].mxu0 %vm310_vm3, %v865_v18 }
 0x5bc   :  { %v935_v50 = vpop.f32.mrb[12].mxu0 }
 0x5bd   :  { %v942_v53 = vrot.slane %v935_v50, %v1689_v29  ;;  %v1204_v56 = vpop.f32.mrb[13].mxu0  ;;  %v950_v19 = vrot.slane %v935_v50, %v394_v42 }
 0x5bf   :  { %v943_v5 = vmul.f32 %v942_v53, %v1856_v39  ;;  %v944_v59 = vmul.f32 %v942_v53, %v723_v36  ;;  %v945_v33 = vmul.f32 %v942_v53, %v728_v0  ;;  %v946_v34 = vmul.f32 %v942_v53, %v733_v49 }
 0x5c1   :  { %v951_v35 = vadd.f32 %v950_v19, %v943_v5  ;;  %v952_v62 = vadd.f32 %v950_v19, %v944_v59  ;;  %v953_v37 = vadd.f32 %v950_v19, %v945_v33  ;;  %v954_v38 = vadd.f32 %v950_v19, %v946_v34 }
 0x5c3   :  { %v955_v2 = vmax.f32 %v951_v35, 0.0  ;;  %v956_v40 = vmax.f32 %v952_v62, 0.0  ;;  %v957_v41 = vmax.f32 %v953_v37, 0.0  ;;  %v958_v6 = vmax.f32 %v954_v38, 0.0 }
 0x5c5   :  { %959 = vst [vmem:[%s1898_s9] sm:$0xff] %v955_v2  ;;  %960 = vst [vmem:[%s1898_s9 + $0x8] sm:$0xff] %v956_v40 }
 0x5c6   :  { %961 = vst [vmem:[%s1898_s9 + $0x10] sm:$0xff] %v957_v41  ;;  %962 = vst [vmem:[%s1898_s9 + $0x18] sm:$0xff] %v958_v6 }

</bundles_post_ra>
